<compile_context>
chip_gen: v6e
topology: v6e:2x2x1
jax: 0.10.0
libtpu: 0.0.40
codegen_flags: <defaults>
</compile_context>

<pallas_src>
import functools

import jax
import jax.numpy as jnp
from jax import lax
from jax.experimental import pallas as pl
from jax.experimental.pallas import tpu as pltpu


# Above the 16 MiB (v5e) / 32 MiB (v6e, v7x) scoped-VMEM defaults, below the
# 64 MiB physical VMEM of a v7x TensorCore.
_VMEM_LIMIT_BYTES = 48 * 1024 * 1024


# --------------------------------------------------------------------------- #
# Prologue: per-(batch, head) K / V projections, computed exactly once.
# --------------------------------------------------------------------------- #
def _kv_proj_kernel(k_in_ref, v_in_ref, wk_ref, bk_ref, wv_ref, bv_ref,
                    k_out_ref, v_out_ref):
    """One (batch, head) step: project K and V for this head."""
    k = jnp.dot(k_in_ref[...], wk_ref[...],
                preferred_element_type=jnp.float32) + bk_ref[...]
    v = jnp.dot(v_in_ref[...], wv_ref[...],
                preferred_element_type=jnp.float32) + bv_ref[...]
    k_out_ref[...] = k.astype(k_out_ref.dtype)
    v_out_ref[...] = v.astype(v_out_ref.dtype)


# --------------------------------------------------------------------------- #
# Main kernel: one (batch, query-tile, head) step.
# --------------------------------------------------------------------------- #
def _mha_kernel(q_ref, k_ref, v_ref,
                wq_ref, bq_ref, wo_ref, bo_ref,
                o_ref,
                acc_ref,
                *, num_heads):
    h = pl.program_id(2)
    cdt = jnp.bfloat16

    # Query projection for this head (scale d_model**-0.5 folded into wq/bq).
    q = jnp.dot(q_ref[...], wq_ref[h],
                preferred_element_type=jnp.float32) + bq_ref[h]       # (tq, hd)

    # Scores: contract head_dim of q against head_dim of k -- no explicit k.T.
    s = lax.dot_general(q.astype(cdt), k_ref[...],
                        (((1,), (1,)), ((), ())),
                        preferred_element_type=jnp.float32)           # (tq, T1)

    # Softmax in f32; EUP exp + approximate reciprocal instead of a divide.
    s_max = jnp.max(s, axis=-1, keepdims=True)
    p = jnp.exp(s - s_max)
    p = p * pl.reciprocal(jnp.sum(p, axis=-1, keepdims=True), approx=True)

    o_h = jnp.dot(p.astype(cdt), v_ref[...],
                  preferred_element_type=jnp.float32)                 # (tq, hd)

    # This head's slice of the output projection, lane-dense (tq, D).
    contrib = jnp.dot(o_h.astype(cdt), wo_ref[h],
                      preferred_element_type=jnp.float32)             # (tq, D)

    @pl.when(h == 0)
    def _():
        acc_ref[...] = contrib          # first head: write, no zero-init pass

    @pl.when(h > 0)
    def _():
        acc_ref[...] += contrib

    @pl.when(h == num_heads - 1)
    def _():
        o_ref[...] = (acc_ref[...] + bo_ref[...]).astype(o_ref.dtype)


def _pick_q_block(t2, q_block):
    """Query-tile size; never larger than 256 (VMEM safe on v7x)."""
    if q_block is not None:
        assert t2 % q_block == 0, "q_block must divide the query length"
        return q_block
    if t2 <= 256:
        return t2
    for cand in (256, 128, 64, 32, 16, 8):
        if t2 % cand == 0:
            return cand
    # Hardened fallback: largest divisor of t2 that is <= 256 (always exists).
    for cand in range(256, 0, -1):
        if t2 % cand == 0:
            return cand


def multi_head_attention(init_v, init_k, init_q, params, *, num_heads,
                         q_block=None):
    """Pallas implementation of Multi_Head_Attention.forward (mask=None, eval)."""
    B, T1, D = init_v.shape
    _, T2, _ = init_q.shape
    if D % num_heads != 0:
        raise ValueError("d_model must be divisible by num_heads")
    hd = D // num_heads
    scaling = float(D) ** (-0.5)
    tq = _pick_q_block(T2, q_block)
    n_q = T2 // tq

    adt = jnp.bfloat16                   # activation compute dtype
    wdt = jnp.bfloat16                   # weight compute dtype

    # Cast activations once, in the wrapper (halves DMA + removes in-kernel casts).
    xq = init_q.astype(adt)
    xk = init_k.astype(adt)
    xv = init_v.astype(adt)

    def split_cols(w_t):                 # (D_in, D_out) -> (H, D_in, hd)
        return w_t.reshape(D, num_heads, hd).transpose(1, 0, 2)

    # nn.Linear: y = x @ W.T + b  ->  pass W.T, split per head on the host side.
    wq_h = split_cols(params["wq"].T * scaling).astype(wdt)           # (H, D, hd)
    wk_h = split_cols(params["wk"].T).astype(wdt)                     # (H, D, hd)
    wv_h = split_cols(params["wv"].T).astype(wdt)                     # (H, D, hd)
    wo_h = params["wo"].T.reshape(num_heads, hd, D).astype(wdt)       # (H, hd, D)

    bq_h = (params["bq"] * scaling).reshape(num_heads, 1, hd).astype(jnp.float32)
    bk_h = params["bk"].reshape(num_heads, 1, hd).astype(jnp.float32)
    bv_h = params["bv"].reshape(num_heads, 1, hd).astype(jnp.float32)
    bo = params["bo"].reshape(1, D).astype(jnp.float32)

    # ---------------- Prologue: hoisted K / V projections ------------------ #
    k_proj, v_proj = pl.pallas_call(
        _kv_proj_kernel,
        out_shape=(jax.ShapeDtypeStruct((B, num_heads, T1, hd), adt),
                   jax.ShapeDtypeStruct((B, num_heads, T1, hd), adt)),
        grid_spec=pltpu.PrefetchScalarGridSpec(
            num_scalar_prefetch=0,
            grid=(B, num_heads),
            in_specs=[
                pl.BlockSpec((None, T1, D), lambda b, h: (b, 0, 0)),   # init_k
                pl.BlockSpec((None, T1, D), lambda b, h: (b, 0, 0)),   # init_v
                pl.BlockSpec((None, D, hd), lambda b, h: (h, 0, 0)),   # wk_h
                pl.BlockSpec((None, 1, hd), lambda b, h: (h, 0, 0)),   # bk_h
                pl.BlockSpec((None, D, hd), lambda b, h: (h, 0, 0)),   # wv_h
                pl.BlockSpec((None, 1, hd), lambda b, h: (h, 0, 0)),   # bv_h
            ],
            out_specs=(
                pl.BlockSpec((None, None, T1, hd), lambda b, h: (b, h, 0, 0)),
                pl.BlockSpec((None, None, T1, hd), lambda b, h: (b, h, 0, 0)),
            ),
        ),
        compiler_params=pltpu.CompilerParams(
            dimension_semantics=("parallel", "parallel"),
            vmem_limit_bytes=_VMEM_LIMIT_BYTES),
    )(xk, xv, wk_h, bk_h, wv_h, bv_h)

    # ---------------------- Main attention kernel -------------------------- #
    kernel = functools.partial(_mha_kernel, num_heads=num_heads)

    q_spec = pl.BlockSpec((None, tq, D), lambda b, i, h: (b, i, 0))
    kv_spec = pl.BlockSpec((None, None, T1, hd), lambda b, i, h: (b, h, 0, 0))
    # Resident (constant-index) weights / biases: DMA'd once per kernel launch,
    # indexed per head inside the kernel with h = pl.program_id(2).
    wq_spec = pl.BlockSpec((num_heads, D, hd), lambda b, i, h: (0, 0, 0))
    bq_spec = pl.BlockSpec((num_heads, 1, hd), lambda b, i, h: (0, 0, 0))
    wo_spec = pl.BlockSpec((num_heads, hd, D), lambda b, i, h: (0, 0, 0))
    bo_spec = pl.BlockSpec((1, D), lambda b, i, h: (0, 0))

    # Note (v7x megacore): the two "parallel" axes (B, n_q) are what gets
    # sharded across the 2 TensorCores; keep B * n_q >= 2 at production shapes.
    return pl.pallas_call(
        kernel,
        out_shape=jax.ShapeDtypeStruct((B, T2, D), init_q.dtype),
        grid_spec=pltpu.PrefetchScalarGridSpec(
            num_scalar_prefetch=0,
            grid=(B, n_q, num_heads),
            in_specs=[
                q_spec,               # init_q (bf16)
                kv_spec, kv_spec,     # precomputed per-head K / V projections
                wq_spec, bq_spec,     # query_proj (scale folded in), resident
                wo_spec, bo_spec,     # out_proj, resident
            ],
            out_specs=pl.BlockSpec((None, tq, D), lambda b, i, h: (b, i, 0)),
            scratch_shapes=[pltpu.VMEM((tq, D), jnp.float32)],
        ),
        compiler_params=pltpu.CompilerParams(
            dimension_semantics=("parallel", "parallel", "arbitrary"),
            vmem_limit_bytes=_VMEM_LIMIT_BYTES),
    )(xq, k_proj, v_proj, wq_h, bq_h, wo_h, bo)


# --------------------------------------------------------------------------- #
# Pure-JAX reference & test
# --------------------------------------------------------------------------- #
def _reference(init_v, init_k, init_q, params, *, num_heads):
    """Pure-JAX f32 reference mirroring the PyTorch forward (mask=None, eval)."""
    B, T1, D = init_v.shape
    _, T2, _ = init_q.shape
    hd = D // num_heads
    scaling = float(D) ** (-0.5)

    def lin(x, w, b):
        return x @ w.T + b

    value = lin(init_v, params["wv"], params["bv"])
    key = lin(init_k, params["wk"], params["bk"])
    query = lin(init_q, params["wq"], params["bq"]) * scaling

    def split(x, T):
        return x.reshape(B, T, num_heads, hd).transpose(0, 2, 1, 3)

    value, key, query = split(value, T1), split(key, T1), split(query, T2)
    att = query @ jnp.swapaxes(key, 2, 3)
    att = jax.nn.softmax(att, axis=-1)
    out = att @ value
    out = out.transpose(0, 2, 1, 3).reshape(B, T2, D)
    return lin(out, params["wo"], params["bo"])


if __name__ == "__main__":
    B, T, D, H = 2, 8, 32, 4
    drop_prob = 0.1  # unused at inference

    key = jax.random.PRNGKey(0)
    keys = jax.random.split(key, 11)

    def init_linear(kw, kb, fan_in):
        bound = 1.0 / (fan_in ** 0.5)
        w = jax.random.uniform(kw, (D, D), jnp.float32, -bound, bound)
        b = jax.random.uniform(kb, (D,), jnp.float32, -bound, bound)
        return w, b

    wv, bv = init_linear(keys[0], keys[1], D)
    wk, bk = init_linear(keys[2], keys[3], D)
    wq, bq = init_linear(keys[4], keys[5], D)
    wo, bo = init_linear(keys[6], keys[7], D)
    params = dict(wv=wv, bv=bv, wk=wk, bk=bk, wq=wq, bq=bq, wo=wo, bo=bo)

    init_v = jax.random.normal(keys[8], (B, T, D), jnp.float32)
    init_k = jax.random.normal(keys[9], (B, T, D), jnp.float32)
    init_q = jax.random.normal(keys[10], (B, T, D), jnp.float32)

    out = multi_head_attention(init_v, init_k, init_q, params, num_heads=H)
    out = jax.block_until_ready(out)

    ref = _reference(init_v, init_k, init_q, params, num_heads=H)
    assert out.shape == (B, T, D)
    # bf16 matmul inputs inside the kernels -> bf16-appropriate tolerance.
    assert jnp.allclose(out, ref, atol=2e-2, rtol=2e-2), "mismatch vs reference"

    print("KERNEL_OK")
</pallas_src>

<mosaic_0001>
module attributes {stable_mosaic.version = 11 : i64} {
  func.func @_kv_proj_kernel(%arg0: i32, %arg1: i32, %arg2: memref<1x8x32xbf16, #tpu.memory_space<vmem>>, %arg3: memref<1x8x32xbf16, #tpu.memory_space<vmem>>, %arg4: memref<1x32x8xbf16, #tpu.memory_space<vmem>>, %arg5: memref<1x1x8xf32, #tpu.memory_space<vmem>>, %arg6: memref<1x32x8xbf16, #tpu.memory_space<vmem>>, %arg7: memref<1x1x8xf32, #tpu.memory_space<vmem>>, %arg8: memref<1x1x8x8xbf16, #tpu.memory_space<vmem>>, %arg9: memref<1x1x8x8xbf16, #tpu.memory_space<vmem>>) attributes {dimension_semantics = [#tpu.dimension_semantics<parallel>, #tpu.dimension_semantics<parallel>], iteration_bounds = array<i64: 2, 4>, scalar_prefetch = 0 : i64, scratch_operands = 0 : i64, tpu.core_type = #tpu.core_type<tc>, window_params = [{transform_indices = @transform_0, window_bounds = array<i64: 1, 8, 32>}, {transform_indices = @transform_1, window_bounds = array<i64: 1, 8, 32>}, {transform_indices = @transform_2, window_bounds = array<i64: 1, 32, 8>}, {transform_indices = @transform_3, window_bounds = array<i64: 1, 1, 8>}, {transform_indices = @transform_4, window_bounds = array<i64: 1, 32, 8>}, {transform_indices = @transform_5, window_bounds = array<i64: 1, 1, 8>}, {transform_indices = @transform_6, window_bounds = array<i64: 1, 1, 8, 8>}, {transform_indices = @transform_7, window_bounds = array<i64: 1, 1, 8, 8>}]} {
    %c0 = arith.constant 0 : index
    %c0_0 = arith.constant 0 : index
    %c0_1 = arith.constant 0 : index
    %0 = vector.load %arg2[%c0, %c0_0, %c0_1] : memref<1x8x32xbf16, #tpu.memory_space<vmem>>, vector<1x8x32xbf16>
    %1 = vector.shape_cast %0 : vector<1x8x32xbf16> to vector<8x32xbf16>
    %c0_2 = arith.constant 0 : index
    %c0_3 = arith.constant 0 : index
    %c0_4 = arith.constant 0 : index
    %2 = vector.load %arg4[%c0_2, %c0_3, %c0_4] : memref<1x32x8xbf16, #tpu.memory_space<vmem>>, vector<1x32x8xbf16>
    %3 = vector.shape_cast %2 : vector<1x32x8xbf16> to vector<32x8xbf16>
    %cst = arith.constant dense<0.000000e+00> : vector<8x8xf32>
    %4 = tpu.matmul %1, %3, %cst {dimension_numbers = #tpu.dot_dimension_numbers<[1], [0], [0], [1], [0, 0, 1, 1], [], []>} : vector<8x32xbf16>, vector<32x8xbf16>, vector<8x8xf32> -> vector<8x8xf32>
    %c0_5 = arith.constant 0 : index
    %c0_6 = arith.constant 0 : index
    %c0_7 = arith.constant 0 : index
    %5 = vector.load %arg5[%c0_5, %c0_6, %c0_7] : memref<1x1x8xf32, #tpu.memory_space<vmem>>, vector<1x1x8xf32>
    %6 = vector.shape_cast %5 : vector<1x1x8xf32> to vector<1x8xf32>
    %7 = vector.broadcast %6 : vector<1x8xf32> to vector<8x8xf32>
    %8 = arith.addf %4, %7 : vector<8x8xf32>
    %c0_8 = arith.constant 0 : index
    %c0_9 = arith.constant 0 : index
    %c0_10 = arith.constant 0 : index
    %9 = vector.load %arg3[%c0_8, %c0_9, %c0_10] : memref<1x8x32xbf16, #tpu.memory_space<vmem>>, vector<1x8x32xbf16>
    %10 = vector.shape_cast %9 : vector<1x8x32xbf16> to vector<8x32xbf16>
    %c0_11 = arith.constant 0 : index
    %c0_12 = arith.constant 0 : index
    %c0_13 = arith.constant 0 : index
    %11 = vector.load %arg6[%c0_11, %c0_12, %c0_13] : memref<1x32x8xbf16, #tpu.memory_space<vmem>>, vector<1x32x8xbf16>
    %12 = vector.shape_cast %11 : vector<1x32x8xbf16> to vector<32x8xbf16>
    %cst_14 = arith.constant dense<0.000000e+00> : vector<8x8xf32>
    %13 = tpu.matmul %10, %12, %cst_14 {dimension_numbers = #tpu.dot_dimension_numbers<[1], [0], [0], [1], [0, 0, 1, 1], [], []>} : vector<8x32xbf16>, vector<32x8xbf16>, vector<8x8xf32> -> vector<8x8xf32>
    %c0_15 = arith.constant 0 : index
    %c0_16 = arith.constant 0 : index
    %c0_17 = arith.constant 0 : index
    %14 = vector.load %arg7[%c0_15, %c0_16, %c0_17] : memref<1x1x8xf32, #tpu.memory_space<vmem>>, vector<1x1x8xf32>
    %15 = vector.shape_cast %14 : vector<1x1x8xf32> to vector<1x8xf32>
    %16 = vector.broadcast %15 : vector<1x8xf32> to vector<8x8xf32>
    %17 = arith.addf %13, %16 : vector<8x8xf32>
    %18 = arith.truncf %8 : vector<8x8xf32> to vector<8x8xbf16>
    %c0_18 = arith.constant 0 : index
    %c0_19 = arith.constant 0 : index
    %c0_20 = arith.constant 0 : index
    %c0_21 = arith.constant 0 : index
    %19 = vector.load %arg8[%c0_18, %c0_19, %c0_20, %c0_21] : memref<1x1x8x8xbf16, #tpu.memory_space<vmem>>, vector<1x1x8x8xbf16>
    %20 = vector.shape_cast %19 : vector<1x1x8x8xbf16> to vector<8x8xbf16>
    %21 = vector.shape_cast %18 : vector<8x8xbf16> to vector<1x1x8x8xbf16>
    tpu.vector_store %arg8[%c0_18, %c0_19, %c0_20, %c0_21], %21 {strides = array<i32>} : memref<1x1x8x8xbf16, #tpu.memory_space<vmem>>, vector<1x1x8x8xbf16>,
    %22 = arith.truncf %17 : vector<8x8xf32> to vector<8x8xbf16>
    %c0_22 = arith.constant 0 : index
    %c0_23 = arith.constant 0 : index
    %c0_24 = arith.constant 0 : index
    %c0_25 = arith.constant 0 : index
    %23 = vector.load %arg9[%c0_22, %c0_23, %c0_24, %c0_25] : memref<1x1x8x8xbf16, #tpu.memory_space<vmem>>, vector<1x1x8x8xbf16>
    %24 = vector.shape_cast %23 : vector<1x1x8x8xbf16> to vector<8x8xbf16>
    %25 = vector.shape_cast %22 : vector<8x8xbf16> to vector<1x1x8x8xbf16>
    tpu.vector_store %arg9[%c0_22, %c0_23, %c0_24, %c0_25], %25 {strides = array<i32>} : memref<1x1x8x8xbf16, #tpu.memory_space<vmem>>, vector<1x1x8x8xbf16>,
    return
  }
  func.func @transform_0(%arg0: i32, %arg1: i32) -> (i32, i32, i32) {
    %c0_i32 = arith.constant 0 : i32
    %c0_i32_0 = arith.constant 0 : i32
    %c0_i32_1 = arith.constant 0 : i32
    return %arg0, %c0_i32, %c0_i32_0 : i32, i32, i32
  }
  func.func @transform_1(%arg0: i32, %arg1: i32) -> (i32, i32, i32) {
    %c0_i32 = arith.constant 0 : i32
    %c0_i32_0 = arith.constant 0 : i32
    %c0_i32_1 = arith.constant 0 : i32
    return %arg0, %c0_i32, %c0_i32_0 : i32, i32, i32
  }
  func.func @transform_2(%arg0: i32, %arg1: i32) -> (i32, i32, i32) {
    %c0_i32 = arith.constant 0 : i32
    %c0_i32_0 = arith.constant 0 : i32
    %c0_i32_1 = arith.constant 0 : i32
    return %arg1, %c0_i32, %c0_i32_0 : i32, i32, i32
  }
  func.func @transform_3(%arg0: i32, %arg1: i32) -> (i32, i32, i32) {
    %c0_i32 = arith.constant 0 : i32
    %c0_i32_0 = arith.constant 0 : i32
    %c0_i32_1 = arith.constant 0 : i32
    return %arg1, %c0_i32, %c0_i32_0 : i32, i32, i32
  }
  func.func @transform_4(%arg0: i32, %arg1: i32) -> (i32, i32, i32) {
    %c0_i32 = arith.constant 0 : i32
    %c0_i32_0 = arith.constant 0 : i32
    %c0_i32_1 = arith.constant 0 : i32
    return %arg1, %c0_i32, %c0_i32_0 : i32, i32, i32
  }
  func.func @transform_5(%arg0: i32, %arg1: i32) -> (i32, i32, i32) {
    %c0_i32 = arith.constant 0 : i32
    %c0_i32_0 = arith.constant 0 : i32
    %c0_i32_1 = arith.constant 0 : i32
    return %arg1, %c0_i32, %c0_i32_0 : i32, i32, i32
  }
  func.func @transform_6(%arg0: i32, %arg1: i32) -> (i32, i32, i32, i32) {
    %c0_i32 = arith.constant 0 : i32
    %c0_i32_0 = arith.constant 0 : i32
    %c0_i32_1 = arith.constant 0 : i32
    return %arg0, %arg1, %c0_i32, %c0_i32_0 : i32, i32, i32, i32
  }
  func.func @transform_7(%arg0: i32, %arg1: i32) -> (i32, i32, i32, i32) {
    %c0_i32 = arith.constant 0 : i32
    %c0_i32_0 = arith.constant 0 : i32
    %c0_i32_1 = arith.constant 0 : i32
    return %arg0, %arg1, %c0_i32, %c0_i32_0 : i32, i32, i32, i32
  }
}

</mosaic_0001>

<bundles_post_ra>
// kernel: tpu_custom_call.1
= control target key start
LH: loop header
LB: loop body
LE: loop exit
PB: predicated region body
PF: predicated region fallthrough
CT: control target
= control target key end

     0   :  { %s1220_s0 = inlined_call_operand.vmem [shape: bf16[2,8,32], index: 0, kind: input, shape index: {}]   ;;  %s1221_s1 = inlined_call_operand.vmem [shape: bf16[2,8,32], index: 1, kind: input, shape index: {}]   ;;  %s1222_s2 = inlined_call_operand.vmem [shape: bf16[4,32,8], index: 2, kind: input, shape index: {}]   ;;  %s1223_s3 = inlined_call_operand.vmem [shape: f32[4,1,8], index: 3, kind: input, shape index: {}]   ;;  %s1224_s4 = inlined_call_operand.vmem [shape: bf16[4,32,8], index: 4, kind: input, shape index: {}]   ;;  %s1225_s5 = inlined_call_operand.vmem [shape: f32[4,1,8], index: 5, kind: input, shape index: {}]   ;;  %s1226_s6 = inlined_call_operand.hbm [shape: bf16[2,4,8,8], index: 6, kind: output, shape index: {0}]   ;;  %s1227_s7 = inlined_call_operand.hbm [shape: bf16[2,4,8,8], index: 7, kind: output, shape index: {1}]  }
   0x1   :  { %1230 = sst [smem:[#allocation10_spill]] %s1220_s0 }
   0x2   :  { %1231 = sst [smem:[#allocation11_spill]] %s1221_s1 }
   0x3   :  { %1232 = sst [smem:[#allocation12_spill]] %s1222_s2 }
   0x4   :  { %13 = vsyncpa [#allocation3], 0 }
   0x5   :  { %15 = vsyncpa [#allocation3 + $0x1], 0 }
   0x6   :  { %16 = vsyncpa [#allocation5], 0 }
   0x7   :  { %18 = vsyncpa [#allocation5 + $0x1], 0  ;;  %s1026_s24 = smov 0   ;;  %s1028_s25 = smov 0  }
   0x8   :  { %s1030_s26 = smov 0   ;;  %s1032_s27 = smov 0  }
   0x9   :  { %s1034_s28 = smov 0   ;;  %s1036_s29 = smov 0  }
   0xa   :  { %s1038_s30 = smov 0   ;;  %s1040_s8 = smov 0  }
   0xb LB: > { %s723_s9 = sadd.s32 4294967295, %s980_s8   ;;  %s724_s10 = sadd.s32 4294967294, %s980_s8   ;;  %s980_s8 = sphi %s1040_s8, %s24_s8   ;;  %s976_s30 = sphi %s1038_s30, %s1248_s30   ;;  %s972_s29 = sphi %s1036_s29, %s1247_s29   ;;  %s968_s28 = sphi %s1034_s28, %s1246_s28   ;;  %s964_s27 = sphi %s1032_s27, %s1245_s27   ;;  %s960_s26 = sphi %s1030_s26, %s1244_s26   ;;  %s956_s25 = sphi %s1028_s25, %s1243_s25   ;;  %s952_s24 = sphi %s1026_s24, %s1242_s24  }
   0xc   : > { %s33_s11 = sadd.s32 1, %s972_s29  ;;  %s36_s12 = sadd.s32 1, %s976_s30 }
   0xd   : > { %p34_p0 = scmp.ge.s32.totalorder %s33_s11, 4  ;;  %p211_p1 = scmp.ne.s32.totalorder %s960_s26, %s956_s25 }
   0xe   : > { %p212_p2 = scmp.eq.s32.totalorder %s723_s9, 7  ;;  %p217_p5 = scmp.ne.s32.totalorder %s956_s25, %s952_s24 }
   0xf   : > { %s1250_s11 = smov (%p34_p0, %s33_s11), 0  ;;  %s1252_s12 = smov (!%p34_p0, %s36_s12), %s976_s30 }
  0x10   : > { %1233 = sst [smem:[#allocation8_spill]] %s1250_s11  ;;  %s197_s13 = ssub.s32 %s972_s29, %s1250_s11 }
  0x11   : > { %p1077_p3 = por %p212_p2, %p211_p1  ;;  %p38_p4 = scmp.ge.s32.totalorder %s1252_s12, 2 }
  0x12   : > { %p218_p6 = scmp.eq.s32.totalorder %s724_s10, 7  ;;  %p727_p7 = scmp.ge.s32.totalorder %s980_s8, 1 }
  0x13   : > { %s1254_s12 = smov (%p38_p4, %s1252_s12), 0  ;;  %p306_p9 = scmp.lt.s32.totalorder %s980_s8, 9 }
  0x14   : > { %1235 = sst [smem:[#allocation9_spill]] %s1254_s12  ;;  %p1086_p8 = por %p218_p6, %p217_p5 }
  0x15   : > { %s196_s16 = ssub.s32 %s976_s30, %s1254_s12  ;;  %s201_s17 = sadd.s32 1, %s960_s26 }
  0x16   : > { %s198_s18 = sor.u32 %s197_s13, %s196_s16  ;;  %p307_p10 = pnand %p727_p7, %p306_p9 }
  0x17   : > { %p199_p11 = scmp.eq.s32.totalorder %s198_s18, 0  ;;  %p370_p12 = scmp.lt.s32.totalorder (!%p307_p10), %s964_s27, 3 }
  0x18   : > { %310 = sbr.rel (%p307_p10) target bundleno = 274 (0x112), region = 44  ;;  %p362_p13 = scmp.lt.s32.totalorder (!%p307_p10), %s968_s28, 1 }
  0x19   : > { %s1095_s19 = scalar_select %p199_p11, %s960_s26, %s201_s17  }
  0x1a   : > { %s1237_s2 = sld [smem:[#allocation12_spill]] (!%p307_p10)  ;;  %s746_s13 = sshll.u32 (!%p307_p10), %s968_s28, 2 }
  0x1b   : > { %s1238_s0 = sld [smem:[#allocation10_spill]] (!%p307_p10)  ;;  %s544_s9 = sadd.s32 (!%p307_p10), %s964_s27, %s746_s13 }
  0x1c   : > { %s1239_s1 = sld [smem:[#allocation11_spill]] (!%p307_p10) }
  0x1d   : > { %v982_v0 = vmov 0.0   ;;  %s1100_s20 = scalar_select %p370_p12, %s964_s27, 3  ;;  %vm983_vm0 = vmmov 0   ;;  %vm411_vm1 = vcmask 261120   ;;  %vm523_vm2 = vcmask 60416  }
  0x1e   : > { %760 = vmatprep.subr.bf16.mxu0 %v982_v0  ;;  %768 = vmatprep.subr.bf16.mxu1 %v982_v0  ;;  %s363_s21 = scalar_select %p362_p13, %s968_s28, 1 }
  0x1f   : > { %764 = vmatprep.mubr.msk.bf16.mxu0 %vm983_vm0, %v982_v0  ;;  %772 = vmatprep.mubr.msk.bf16.mxu1 %vm983_vm0, %v982_v0  ;;  %s752_s22 = sshll.u32 %s1100_s20, 4 }
  0x20   : > { %s374_s10 = scalar_lea.vmem %s1237_s2, %s752_s22  ;;  %s382_s17 = scalar_lea.vmem %s1224_s4, %s752_s22 }
  0x21   : > { %v854_v1 = vld [vmem:[%s374_s10 + $0x8] sm:$0xff]   ;;  %s730_s18 = sshll.u32 %s363_s21, 2  ;;  %v856_v3 = vld [vmem:[%s374_s10] sm:$0xff]   ;;  %s1117_s10 = sand.u32 1, %s956_s25  }
  0x22   : > { %v855_v2 = vld [vmem:[%s382_s17 + $0x8] sm:$0xff]   ;;  %761 = vmatpush3.bf16.msra.mxu0 %v854_v1  ;;  %v857_v4 = vld [vmem:[%s382_s17] sm:$0xff]   ;;  %s365_s23 = scalar_lea.vmem %s1238_s0, %s730_s18  ;;  %s369_s21 = scalar_lea.vmem %s1239_s1, %s730_s18 }
  0x23   : > { %769 = vmatpush3.bf16.msra.mxu1 %v855_v2  ;;  %762 = vmatprep.subr.bf16.mxu0 %v982_v0  ;;  %v387_v5 = vld [vmem:[%s365_s23] sm:$0xf]  ;;  %s728_s16 = sshll.u32 %s1117_s10, 2  ;;  %s377_s17 = scalar_lea.vmem %s1223_s3, %s1100_s20 }
  0x24   : > { %770 = vmatprep.subr.bf16.mxu1 %v982_v0  ;;  %v455_v6 = vld [vmem:[%s369_s21] sm:$0xf]  ;;  %s385_s18 = scalar_lea.vmem %s1225_s5, %s1100_s20  ;;  %s747_s23 = sshll.u32 %s544_s9, 6 }
  0x25   : > { %v736_v7 = vld [vmem:[%s377_s17] ss:$0 sm:$0xff]  ;;  %s354_s22 = scalar_lea.vmem [#allocation2], %s728_s16  ;;  %s1130_s1 = scalar_lea.vmem [#allocation4], %s728_s16 }
  0x26   : > { %763 = vmatpush3.bf16.msra.mxu0 %v856_v3  ;;  %v740_v8 = vld [vmem:[%s385_s18] ss:$0 sm:$0xff]  ;;  %s548_s21 = sshll.u32 %s354_s22, 4  ;;  %s563_s28 = sshll.u32 %s1130_s1, 4  ;;  %s1138_s21 = int_to_ptr.vmem [resolvable:$true] %s548_s21  ;;  %s1145_s28 = int_to_ptr.vmem [resolvable:$true] %s563_s28 }
  0x27   : > { %771 = vmatpush3.bf16.msra.mxu1 %v857_v4  ;;  %s1136_s27 = scalar_lea.hbm %s1226_s6, %s747_s23  ;;  %s1143_s16 = scalar_lea.hbm %s1227_s7, %s747_s23 }
  0x28   : > { %s528_s11 = scalar_lea.sflag [#allocation3], %s1117_s10  ;;  %s858_s12 = scalar_lea.vmem %s1138_s21, 64 }
  0x29   : > { %765 = vmatmul.mubr.msk.bf16.vlgmr.msra.gmra.mxu0 %vm411_vm1, %v387_v5  ;;  %p859_p0 = scmp.ne.s32.totalorder %s1138_s21, %s858_s12  ;;  %s984_s17 = smov [#allocation2]  }
  0x2a   : > { %773 = vmatmul.mubr.msk.bf16.vlgmr.msra.gmra.mxu1 %vm411_vm1, %v455_v6  ;;  %s862_s18 = sshll.u32 %s984_s17, 4  ;;  %s863_s18 = int_to_ptr.vmem [resolvable:$false] %s862_s18 }
  0x2b   : > { %p860_p1 = pnand %p859_p0, %p1077_p3  ;;  %s864_s9 = scalar_lea.vmem %s863_s18, 128 }
  0x2c   : > { %p865_p4 = scmp.lt.s32.totalorder %s1138_s21, %s863_s18  ;;  %p866_p5 = scmp.lt.s32.totalorder %s864_s9, %s858_s12 }
  0x2d   : > { %p861_p2 = pneg %p860_p1 }
  0x2e   : > { %p867_p6 = por %p866_p5, %p865_p4 }
  0x30   : > { %p868_p7 = pnand %p867_p6, %p861_p2 }
  0xe9   : > { %v449_v9 = vpop.f32.mrf.mxu0 }
  0xea   : > { %v450_v10 = vadd.f32 %v736_v7, %v449_v9  ;;  %v516_v11 = vpop.f32.mrf.mxu1 }
  0xeb   : > { %v517_v12 = vadd.f32 %v740_v8, %v516_v11  ;;  %v766_v13 = vpop.f32.mrf.mxu0 }
  0xec   : > { %v522_v14 = vpack.c.bf16 %v450_v10, %v450_v10  ;;  %v774_v15 = vpop.f32.mrf.mxu1 }
  0xed   : > { %v525_v16 = vpack.c.bf16 %v517_v12, %v517_v12  ;;  %v452_v17 = vpop.f32.mrf.mxu0 }
  0xee   : > { %v519_v18 = vpop.f32.mrf.mxu1  ;;  %524 = vst.msk [vmem:[%s354_s22] sm:$0xf] %vm523_vm2, %v522_v14 }
  0xef   : > { %v767_v19 = vpop.f32.mrf.mxu0 }
  0xf0   : > { %871 = shalt.err (!%p868_p7)
}
  0xf1   : > { %s872_s23 = scalar_lea.hbm %s1136_s27, 64  ;;  %s876_s2 = scalar_lea.hbm %s1226_s6, 512 }
  0xf2   : > { %p873_p9 = scmp.ne.s32.totalorder %s1136_s27, %s872_s23  ;;  %p877_p12 = scmp.lt.s32.totalorder %s1136_s27, %s1226_s6 }
  0xf3   : > { %p878_p13 = scmp.lt.s32.totalorder %s876_s2, %s872_s23 }
  0xf4   : > { %p874_p10 = pnand %p873_p9, %p1077_p3 }
  0xf5   : > { %p879_p0 = por %p878_p13, %p877_p12 }
  0xf6   : > { %p875_p11 = pneg %p874_p10 }
  0xf8   : > { %p880_p1 = pnand %p879_p0, %p875_p11 }
  0xfa   : > { %883 = shalt.err (!%p880_p1)
}
  0xfb   : > { %776 = dma.vmem_to_hbm [thread:$0]  (%p1077_p3), %s1138_s21, 64, %s1136_s27, %s528_s11   ;;  %526 = vst.msk [vmem:[%s1130_s1] sm:$0xf] %vm523_vm2, %v525_v16  ;;  %v775_v20 = vpop.f32.mrf.mxu1 }
  0xfc   : > { %s533_s12 = scalar_lea.sflag [#allocation5], %s1117_s10  ;;  %s884_s17 = scalar_lea.vmem %s1145_s28, 64 }
  0xfd   : > { %p885_p2 = scmp.ne.s32.totalorder %s1145_s28, %s884_s17  ;;  %s985_s18 = smov [#allocation4]  }
  0xfe   : > { %s888_s9 = sshll.u32 %s985_s18, 4  ;;  %s889_s9 = int_to_ptr.vmem [resolvable:$false] %s888_s9 }
  0xff   : > { %p886_p4 = pnand %p885_p2, %p1077_p3  ;;  %s890_s23 = scalar_lea.vmem %s889_s9, 128 }
 0x100   : > { %p891_p6 = scmp.lt.s32.totalorder %s1145_s28, %s889_s9  ;;  %p892_p7 = scmp.lt.s32.totalorder %s890_s23, %s884_s17 }
 0x101   : > { %p887_p5 = pneg %p886_p4 }
 0x102   : > { %p893_p9 = por %p892_p7, %p891_p6 }
 0x104   : > { %p894_p10 = pnand %p893_p9, %p887_p5 }
 0x106   : > { %897 = shalt.err (!%p894_p10)
}
 0x107   : > { %s898_s1 = scalar_lea.hbm %s1143_s16, 64  ;;  %s902_s27 = scalar_lea.hbm %s1227_s7, 512 }
 0x108   : > { %p899_p11 = scmp.ne.s32.totalorder %s1143_s16, %s898_s1  ;;  %p903_p0 = scmp.lt.s32.totalorder %s1143_s16, %s1227_s7 }
 0x109   : > { %p904_p1 = scmp.lt.s32.totalorder %s902_s27, %s898_s1 }
 0x10a   : > { %p900_p12 = pnand %p899_p11, %p1077_p3 }
 0x10b   : > { %p905_p2 = por %p904_p1, %p903_p0 }
 0x10c   : > { %p901_p13 = pneg %p900_p12 }
 0x10e   : > { %p906_p4 = pnand %p905_p2, %p901_p13 }
 0x110   : > { %909 = shalt.err (!%p906_p4)
}
 0x111   : > { %777 = dma.vmem_to_hbm [thread:$0]  (%p1077_p3), %s1145_s28, 64, %s1143_s16, %s533_s12  }
 0x112 PF: > { %p787_p5 = scmp.ge.s32.totalorder %s980_s8, 2  ;;  %s575_s0 = sand.u32 1, %s952_s24  }
 0x113   : > { %s576_s2 = scalar_lea.sflag [#allocation3], %s575_s0 }
 0x114   : > { %p781_p6 = pnand %p787_p5, %p1086_p8 }
 0x116   : > { %p782_p7 = pneg %p781_p6 }
 0x118   : > { %943 = dma.done.wait (%p782_p7), %s576_s2, 64  }
 0x119   : > { %945 = vsyncadd (%p782_p7), %s576_s2, 4294967232  ;;  %s585_s20 = scalar_lea.sflag [#allocation5], %s575_s0 }
 0x11a   : > { %947 = dma.done.wait (%p782_p7), %s585_s20, 64  }
 0x11b   : > { %949 = vsyncadd (%p782_p7), %s585_s20, 4294967232  ;;  %s24_s8 = sadd.s32 1, %s980_s8   ;;  %s1240_s14 = sld [smem:[#allocation8_spill]] }
 0x11c   : > { %p21_p9 = scmp.ge.s32.totalorder %s24_s8, 10   ;;  %s1241_s16 = sld [smem:[#allocation9_spill]] }
 0x11d   : > { %s1242_s24 = smov %s956_s25  ;;  %s1243_s25 = smov %s960_s26 }
 0x11e   : > { %s1244_s26 = smov %s1095_s19  ;;  %s1245_s27 = smov %s972_s29 }
 0x11f   : > { %s1246_s28 = smov %s976_s30  ;;  %23 = sbr.rel (!%p21_p9) target bundleno = 11 (0xb), region = 111 }
 0x121   : > { %s1247_s29 = smov %s1240_s14 }
 0x122   : > { %s1248_s30 = smov %s1241_s16 }
 0x124   :  { %590 = vsyncpa [#allocation3], 1 }
 0x125   :  { %592 = vsyncpa [#allocation3 + $0x1], 1 }
 0x126   :  { %593 = vsyncpa [#allocation5], 1 }
 0x127   :  { %595 = vsyncpa [#allocation5 + $0x1], 1 }

</bundles_post_ra>
